<compile_context>
chip_gen: v7x
topology: tpu7x:2x2x1
jax: 0.10.0
libtpu: 0.0.40
codegen_flags: <defaults>
</compile_context>

<pallas_src>
import functools

import jax
import jax.numpy as jnp
from jax.experimental import pallas as pl
from jax.experimental.pallas import tpu as pltpu

_IGNORE_INDEX = -1


def _mlm_ce_partial_kernel(logits_ref, tgt_ref, sum_ref, cnt_ref, *,
                           tile_rows, n_valid_rows):
    """One row tile of the MLM cross-entropy -> per-tile (sum, count) partials."""
    i = pl.program_id(0)

    x = logits_ref[...]                       # (TILE_N, V), native dtype
    tgt = tgt_ref[...]                        # (TILE_N, 1), int32

    # Row max on the native dtype (order-preserving -> exact for bf16/f32).
    m = jnp.max(x, axis=-1, keepdims=True).astype(jnp.float32)          # (TILE_N, 1)

    # Target-logit pick on the native dtype: at most one column matches per row,
    # so the native-dtype sum is exact.  Ignored rows (tgt == -1) and garbage
    # rows of a ragged last tile match no column -> 0, and are then dropped by
    # the `valid` select below (keep this coupling when refactoring).
    col_ids = jax.lax.broadcasted_iota(jnp.int32, x.shape, 1)
    picked = jnp.where(col_ids == tgt, x, jnp.zeros_like(x))
    tgt_logit = jnp.sum(picked, axis=-1, keepdims=True).astype(jnp.float32)

    # exp / sum-exp in f32.  Single consumer of the f32 cast, so Mosaic does not
    # need to keep a tile-sized f32 buffer live across several expressions.
    sumexp = jnp.sum(jnp.exp(x.astype(jnp.float32) - m),
                     axis=-1, keepdims=True)                             # (TILE_N, 1)

    per_row = m + jnp.log(sumexp) - tgt_logit       # logsumexp - logit[target]

    # Validity mask: real row (handles the un-padded ragged last tile) and
    # target != ignore_index.
    row_ids = i * tile_rows + jax.lax.broadcasted_iota(jnp.int32, tgt.shape, 0)
    valid = jnp.logical_and(tgt != _IGNORE_INDEX, row_ids < n_valid_rows)

    # Use a select (not a multiply) so NaN/Inf coming from garbage rows of a
    # partial tile cannot leak into the sum.
    tile_sum = jnp.sum(jnp.where(valid, per_row, 0.0), axis=0, keepdims=True)  # (1,1)
    tile_cnt = jnp.sum(valid.astype(jnp.float32), axis=0, keepdims=True)       # (1,1)

    # Lane-dense partial blocks; wrapper reads [tile, 0, 0].
    sum_ref[...] = jnp.broadcast_to(tile_sum, sum_ref.shape)
    cnt_ref[...] = jnp.broadcast_to(tile_cnt, cnt_ref.shape)


def _tpu_vmem_capacity_bytes():
    try:
        return int(getattr(pltpu.get_tpu_info(), "vmem_capacity_bytes", 128 << 20))
    except Exception:
        return 128 << 20


def _choose_tile_rows(n_rows, n_cols, itemsize):
    """Row tile: multiple of 8, <= n_rows.  ~4 MiB of native-dtype logits per
    tile on 64 MiB-VMEM parts (v7x-class), ~12 MiB on 128 MiB parts (v5e/v6e)."""
    if n_rows <= 8:
        return max(1, n_rows)
    small_vmem = _tpu_vmem_capacity_bytes() <= (80 << 20)
    target_tile_bytes = (4 << 20) if small_vmem else (12 << 20)
    rows = target_tile_bytes // max(1, n_cols * itemsize)
    rows = int(max(8, min(rows, 2048, n_rows)))
    return (rows // 8) * 8


def pretraining_loss(logits, targets, targets_alpha=1.0, tile_rows=None):
    """logits  = (mlm_logits (B,S,V), sop_logits (B,2), bce_logits (...))
       targets = (mlm_targets (B,S) int, sop_targets (B,) int, bce_targets (...))
       Returns a scalar f32 loss matching PyTorch PretrainingLoss.forward."""
    mlm_logits, sop_logits, bce_logits = logits
    mlm_targets, sop_targets, bce_targets = targets

    V = mlm_logits.shape[-1]
    # Native dtype on the wire; NO padded copy of the big logits array.
    mlm_logits2d = mlm_logits.reshape(-1, V)
    mlm_tgt_col = mlm_targets.reshape(-1, 1).astype(jnp.int32)
    n_rows = mlm_logits2d.shape[0]
    itemsize = jnp.dtype(mlm_logits2d.dtype).itemsize

    if tile_rows is not None:
        tile_n = int(tile_rows)
    else:
        tile_n = _choose_tile_rows(n_rows, V, itemsize)
    tile_n = max(1, min(tile_n, n_rows))
    num_tiles = -(-n_rows // tile_n)          # ceil; ragged last tile masked in-kernel

    # VMEM budget: double-buffered native-dtype tile + in-kernel f32/i32 temps.
    tile_bytes = tile_n * V * itemsize
    interm_bytes = 3 * tile_n * V * 4
    cap = (48 << 20) if _tpu_vmem_capacity_bytes() <= (80 << 20) else (100 << 20)
    vmem_limit = int(min(cap, max(16 << 20,
                                  2 * tile_bytes + interm_bytes + (2 << 20))))

    kernel = functools.partial(_mlm_ce_partial_kernel,
                               tile_rows=tile_n, n_valid_rows=n_rows)
    part_shape = jax.ShapeDtypeStruct((num_tiles, 8, 128), jnp.float32)
    sums, cnts = pl.pallas_call(
        kernel,
        out_shape=(part_shape, part_shape),
        grid=(num_tiles,),
        in_specs=[
            pl.BlockSpec((tile_n, V), lambda i: (i, 0)),   # streamed MLM logits tile
            pl.BlockSpec((tile_n, 1), lambda i: (i, 0)),   # MLM targets column tile
        ],
        out_specs=(
            pl.BlockSpec((None, 8, 128), lambda i: (i, 0, 0)),   # per-tile loss sum
            pl.BlockSpec((None, 8, 128), lambda i: (i, 0, 0)),   # per-tile valid count
        ),
        compiler_params=pltpu.CompilerParams(
            dimension_semantics=("parallel",),       # independent tiles -> v7x 2-TC safe
            vmem_limit_bytes=vmem_limit),
    )(mlm_logits2d, mlm_tgt_col)

    mlm_sum = jnp.sum(sums[:, 0, 0])
    mlm_cnt = jnp.sum(cnts[:, 0, 0])
    # NOTE: if *every* MLM target is -1 this yields a 0 MLM term, whereas torch
    # CrossEntropyLoss(mean, ignore_index=-1) would return NaN.
    mlm_loss = mlm_sum / jnp.maximum(mlm_cnt, 1.0)

    # ---- SOP CE + BCEWithLogits + combine: tiny tensors, plain JAX (per review).
    sop2d = sop_logits.reshape(-1, 2).astype(jnp.float32)
    sop_t = sop_targets.reshape(-1).astype(jnp.int32)
    sop_m = jnp.max(sop2d, axis=-1)
    sop_lse = sop_m + jnp.log(jnp.sum(jnp.exp(sop2d - sop_m[:, None]), axis=-1))
    sop_pick = jnp.take_along_axis(sop2d, sop_t[:, None], axis=-1)[:, 0]
    sop_loss = jnp.mean(sop_lse - sop_pick)

    x = bce_logits.astype(jnp.float32)
    y = bce_targets.astype(jnp.float32)
    bce_loss = jnp.mean(jnp.maximum(x, 0.0) - x * y + jnp.log1p(jnp.exp(-jnp.abs(x))))

    return mlm_loss + sop_loss + jnp.float32(targets_alpha) * bce_loss


def _reference_loss(logits, targets, targets_alpha=1.0):
    """Pure-JAX reference mirroring torch semantics, for a sanity check."""
    mlm_logits, sop_logits, bce_logits = logits
    mlm_targets, sop_targets, bce_targets = targets

    def ce(lg, tg, ignore=None):
        lg = lg.reshape(-1, lg.shape[-1]).astype(jnp.float32)
        tg = tg.reshape(-1).astype(jnp.int32)
        m = jnp.max(lg, axis=-1)
        lse = m + jnp.log(jnp.sum(jnp.exp(lg - m[:, None]), axis=-1))
        picked = jnp.take_along_axis(lg, jnp.clip(tg, 0)[:, None], axis=-1)[:, 0]
        per = lse - picked
        if ignore is None:
            return jnp.mean(per)
        valid = (tg != ignore).astype(jnp.float32)
        return jnp.sum(per * valid) / jnp.maximum(jnp.sum(valid), 1.0)

    x = bce_logits.astype(jnp.float32)
    y = bce_targets.astype(jnp.float32)
    bce = jnp.mean(jnp.maximum(x, 0.0) - x * y + jnp.log1p(jnp.exp(-jnp.abs(x))))
    return ce(mlm_logits, mlm_targets, ignore=-1) + ce(sop_logits, sop_targets) \
        + targets_alpha * bce


if __name__ == "__main__":
    key = jax.random.PRNGKey(0)
    k1, k2, k3, k4, k5, k6, k7 = jax.random.split(key, 7)

    B, S, V = 2, 9, 32          # N = B*S = 18 -> multi-step grid + ragged last tile

    mlm_logits = jax.random.normal(k1, (B, S, V), dtype=jnp.float32)
    mlm_targets = jax.random.randint(k2, (B, S), 0, V, dtype=jnp.int32)
    ignore_mask = jax.random.bernoulli(k3, 0.25, (B, S))
    mlm_targets = jnp.where(ignore_mask, -1, mlm_targets)

    sop_logits = jax.random.normal(k4, (B, 2), dtype=jnp.float32)
    sop_targets = jax.random.randint(k5, (B,), 0, 2, dtype=jnp.int32)

    bce_logits = jax.random.normal(k6, (B, S), dtype=jnp.float32)
    bce_targets = jax.random.bernoulli(k7, 0.5, (B, S)).astype(jnp.float32)

    logits = (mlm_logits, sop_logits, bce_logits)
    targets = (mlm_targets, sop_targets, bce_targets)

    ref = _reference_loss(logits, targets, targets_alpha=1.0)

    # Forced tile_rows=8: 3-step grid, last tile ragged (rows 16..17 valid only).
    loss_a = jax.block_until_ready(
        pretraining_loss(logits, targets, targets_alpha=1.0, tile_rows=8))
    assert jnp.allclose(loss_a, ref, rtol=1e-5, atol=1e-5), (loss_a, ref)

    # Default generation-aware tile heuristic (16-row tiles here, 2-step grid).
    loss_b = jax.block_until_ready(
        pretraining_loss(logits, targets, targets_alpha=1.0))
    assert jnp.allclose(loss_b, ref, rtol=1e-5, atol=1e-5), (loss_b, ref)

    print("KERNEL_OK")
</pallas_src>

<mosaic_0001>
module attributes {stable_mosaic.version = 11 : i64} {
  func.func @_mlm_ce_partial_kernel(%arg0: i32, %arg1: memref<8x32xf32, #tpu.memory_space<vmem>>, %arg2: memref<8x1xi32, #tpu.memory_space<vmem>>, %arg3: memref<1x8x128xf32, #tpu.memory_space<vmem>>, %arg4: memref<1x8x128xf32, #tpu.memory_space<vmem>>) attributes {dimension_semantics = [#tpu.dimension_semantics<parallel>], iteration_bounds = array<i64: 3>, scalar_prefetch = 0 : i64, scratch_operands = 0 : i64, tpu.core_type = #tpu.core_type<tc>, window_params = [{transform_indices = @transform_0, window_bounds = array<i64: 8, 32>}, {transform_indices = @transform_1, window_bounds = array<i64: 8, 1>}, {transform_indices = @transform_2, window_bounds = array<i64: 1, 8, 128>}, {transform_indices = @transform_3, window_bounds = array<i64: 1, 8, 128>}]} {
    %c0 = arith.constant 0 : index
    %c0_0 = arith.constant 0 : index
    %0 = vector.load %arg1[%c0, %c0_0] : memref<8x32xf32, #tpu.memory_space<vmem>>, vector<8x32xf32>
    %c0_1 = arith.constant 0 : index
    %c0_2 = arith.constant 0 : index
    %1 = vector.load %arg2[%c0_1, %c0_2] : memref<8x1xi32, #tpu.memory_space<vmem>>, vector<8x1xi32>
    %cst = arith.constant dense<0xFF800000> : vector<8xf32>
    %2 = vector.multi_reduction <maximumf>, %0, %cst [1] : vector<8x32xf32> to vector<8xf32>
    %3 = vector.shape_cast %2 : vector<8xf32> to vector<8x1xf32>
    %4 = tpu.iota {dimensions = array<i32: 1>} : vector<8x32xi32>
    %5 = vector.broadcast %1 : vector<8x1xi32> to vector<8x32xi32>
    %6 = arith.cmpi eq, %4, %5 : vector<8x32xi32>
    %cst_3 = arith.constant 0.000000e+00 : f32
    %7 = vector.broadcast %cst_3 : f32 to vector<8x32xf32>
    %8 = arith.select %6, %0, %7 : vector<8x32xi1>, vector<8x32xf32>
    %cst_4 = arith.constant dense<0.000000e+00> : vector<8xf32>
    %9 = vector.multi_reduction <add>, %8, %cst_4 [1] : vector<8x32xf32> to vector<8xf32>
    %10 = vector.shape_cast %9 : vector<8xf32> to vector<8x1xf32>
    %11 = vector.broadcast %3 : vector<8x1xf32> to vector<8x32xf32>
    %12 = arith.subf %0, %11 : vector<8x32xf32>
    %13 = math.exp %12 : vector<8x32xf32>
    %cst_5 = arith.constant dense<0.000000e+00> : vector<8xf32>
    %14 = vector.multi_reduction <add>, %13, %cst_5 [1] : vector<8x32xf32> to vector<8xf32>
    %15 = vector.shape_cast %14 : vector<8xf32> to vector<8x1xf32>
    %16 = math.log %15 : vector<8x1xf32>
    %17 = arith.addf %3, %16 : vector<8x1xf32>
    %18 = arith.subf %17, %10 : vector<8x1xf32>
    %c8_i32 = arith.constant 8 : i32
    %19 = arith.muli %arg0, %c8_i32 : i32
    %20 = tpu.iota {dimensions = array<i32: 0>} : vector<8x1xi32>
    %21 = vector.broadcast %19 : i32 to vector<8x1xi32>
    %22 = arith.addi %21, %20 : vector<8x1xi32>
    %c-1_i32 = arith.constant -1 : i32
    %23 = vector.broadcast %c-1_i32 : i32 to vector<8x1xi32>
    %24 = arith.cmpi ne, %1, %23 : vector<8x1xi32>
    %c18_i32 = arith.constant 18 : i32
    %25 = vector.broadcast %c18_i32 : i32 to vector<8x1xi32>
    %26 = arith.cmpi slt, %22, %25 : vector<8x1xi32>
    %27 = arith.andi %24, %26 : vector<8x1xi1>
    %cst_6 = arith.constant 0.000000e+00 : f32
    %28 = vector.broadcast %cst_6 : f32 to vector<8x1xf32>
    %29 = arith.select %27, %18, %28 : vector<8x1xi1>, vector<8x1xf32>
    %cst_7 = arith.constant dense<0.000000e+00> : vector<1xf32>
    %30 = vector.multi_reduction <add>, %29, %cst_7 [0] : vector<8x1xf32> to vector<1xf32>
    %31 = vector.shape_cast %30 : vector<1xf32> to vector<1x1xf32>
    %32 = arith.extui %27 : vector<8x1xi1> to vector<8x1xi32>
    %33 = arith.sitofp %32 : vector<8x1xi32> to vector<8x1xf32>
    %cst_8 = arith.constant dense<0.000000e+00> : vector<1xf32>
    %34 = vector.multi_reduction <add>, %33, %cst_8 [0] : vector<8x1xf32> to vector<1xf32>
    %35 = vector.shape_cast %34 : vector<1xf32> to vector<1x1xf32>
    %36 = vector.shape_cast %31 : vector<1x1xf32> to vector<1x1xf32>
    %37 = vector.broadcast %36 : vector<1x1xf32> to vector<8x128xf32>
    %c0_9 = arith.constant 0 : index
    %c0_10 = arith.constant 0 : index
    %c0_11 = arith.constant 0 : index
    %38 = vector.load %arg3[%c0_9, %c0_10, %c0_11] : memref<1x8x128xf32, #tpu.memory_space<vmem>>, vector<1x8x128xf32>
    %39 = vector.shape_cast %38 : vector<1x8x128xf32> to vector<8x128xf32>
    %40 = vector.shape_cast %37 : vector<8x128xf32> to vector<1x8x128xf32>
    tpu.vector_store %arg3[%c0_9, %c0_10, %c0_11], %40 {strides = array<i32>} : memref<1x8x128xf32, #tpu.memory_space<vmem>>, vector<1x8x128xf32>,
    %41 = vector.shape_cast %35 : vector<1x1xf32> to vector<1x1xf32>
    %42 = vector.broadcast %41 : vector<1x1xf32> to vector<8x128xf32>
    %c0_12 = arith.constant 0 : index
    %c0_13 = arith.constant 0 : index
    %c0_14 = arith.constant 0 : index
    %43 = vector.load %arg4[%c0_12, %c0_13, %c0_14] : memref<1x8x128xf32, #tpu.memory_space<vmem>>, vector<1x8x128xf32>
    %44 = vector.shape_cast %43 : vector<1x8x128xf32> to vector<8x128xf32>
    %45 = vector.shape_cast %42 : vector<8x128xf32> to vector<1x8x128xf32>
    tpu.vector_store %arg4[%c0_12, %c0_13, %c0_14], %45 {strides = array<i32>} : memref<1x8x128xf32, #tpu.memory_space<vmem>>, vector<1x8x128xf32>,
    return
  }
  func.func @transform_0(%arg0: i32) -> (i32, i32) {
    %c0_i32 = arith.constant 0 : i32
    %c0_i32_0 = arith.constant 0 : i32
    return %arg0, %c0_i32 : i32, i32
  }
  func.func @transform_1(%arg0: i32) -> (i32, i32) {
    %c0_i32 = arith.constant 0 : i32
    %c0_i32_0 = arith.constant 0 : i32
    return %arg0, %c0_i32 : i32, i32
  }
  func.func @transform_2(%arg0: i32) -> (i32, i32, i32) {
    %c0_i32 = arith.constant 0 : i32
    %c0_i32_0 = arith.constant 0 : i32
    %c0_i32_1 = arith.constant 0 : i32
    return %arg0, %c0_i32, %c0_i32_0 : i32, i32, i32
  }
  func.func @transform_3(%arg0: i32) -> (i32, i32, i32) {
    %c0_i32 = arith.constant 0 : i32
    %c0_i32_0 = arith.constant 0 : i32
    %c0_i32_1 = arith.constant 0 : i32
    return %arg0, %c0_i32, %c0_i32_0 : i32, i32, i32
  }
}

</mosaic_0001>

<bundles_post_ra>
// kernel: tpu_custom_call.1
= control target key start
LH: loop header
LB: loop body
LE: loop exit
PB: predicated region body
PF: predicated region fallthrough
CT: control target
= control target key end

     0   :  { %9 = vsyncpa [#allocation3], 0  ;;  %s729_s0 = inlined_call_operand.vmem [shape: f32[18,32], index: 0, kind: input, shape index: {}]   ;;  %s730_s1 = inlined_call_operand.vmem [shape: s32[18,1], index: 1, kind: input, shape index: {}]   ;;  %s731_s2 = inlined_call_operand.hbm [shape: f32[3,8,128], index: 2, kind: output, shape index: {0}]   ;;  %s732_s3 = inlined_call_operand.hbm [shape: f32[3,8,128], index: 3, kind: output, shape index: {1}]  }
   0x1   :  { %11 = vsyncpa [#allocation3 + $0x1], 0 }
   0x2   :  { %12 = vsyncpa [#allocation5], 0 }
   0x3   :  { %14 = vsyncpa [#allocation5 + $0x1], 0  ;;  %s581_s12 = smov 0   ;;  %s583_s13 = smov 0  }
   0x4   :  { %s585_s14 = smov 0   ;;  %s587_s15 = smov 0  }
   0x5 LB: > { %s602_s16 = sadd.s32 4294967295, %s555_s15   ;;  %s393_s17 = sadd.s32 4294967294, %s555_s15   ;;  %s555_s15 = sphi %s587_s15, %s738_s15   ;;  %s551_s14 = sphi %s585_s14, %s737_s14   ;;  %s547_s13 = sphi %s583_s13, %s736_s13   ;;  %s543_s12 = sphi %s581_s12, %s735_s12  }
   0x6   : > { %s606_s18 = sadd.s32 1, %s555_s15   ;;  %s79_s19 = sadd.s32 1, %s551_s14 }
   0x7   : > { %s76_s20 = ssub.s32 %s555_s15, %s606_s18  ;;  %p89_p0 = scmp.ne.s32.totalorder %s551_s14, %s547_s13 }
   0x8   : > { %p77_p1 = scmp.eq.s32.totalorder %s76_s20, 0  ;;  %p90_p2 = scmp.eq.s32.totalorder %s602_s16, 2 }
   0x9   : > { %p95_p3 = scmp.ne.s32.totalorder %s547_s13, %s543_s12  ;;  %p96_p4 = scmp.eq.s32.totalorder %s393_s17, 2 }
   0xa   : > { %s617_s21 = scalar_select %p77_p1, %s551_s14, %s79_s19  }
   0xb   : > { %p619_p5 = por %p90_p2, %p89_p0  ;;  %p623_p6 = por %p96_p4, %p95_p3 }
   0xc   : > { %p396_p7 = scmp.ge.s32.totalorder %s555_s15, 1  ;;  %p154_p8 = scmp.lt.s32.totalorder %s555_s15, 4 }
   0xe   : > { %p155_p9 = pnand %p396_p7, %p154_p8 }
   0xf   : > { %p186_p10 = scmp.lt.s32.totalorder (!%p155_p9), %s602_s16, 2  ;;  %v557_v0 = vmov (!%p155_p9), 0   ;;  %vm196_vm0 = vcmask (!%p155_p9), 261120   ;;  %v200_v7 = vlaneseq (!%p155_p9)  ;;  %s401_s5 = sshll.u32 (!%p155_p9), %s602_s16, 3  ;;  %v558_v18 = vmov (!%p155_p9), 0.0  }
  0x10   : > { %158 = sbr.rel (%p155_p9) target bundleno = 525 (0x20d), region = 28  ;;  %455 = vset.pattern.permute.xlu0 (!%p155_p9), %v557_v0  ;;  %456 = vset.pattern.permute.xlu1 (!%p155_p9), %v557_v0  ;;  %v223_v15 = vstv (!%p155_p9), %s401_s5  ;;  %vm229_vm5 = vcmask (!%p155_p9), 7168   ;;  %s642_s6 = sand.u32 (!%p155_p9), 1, %s547_s13  }
  0x11   : > { %v201_v8 = vand.u32 (!%p155_p9), 127, %v200_v7  ;;  %v222_v14 = vshrl.u32 (!%p155_p9), %v200_v7, 7  ;;  %s397_s7 = sshll.u32 (!%p155_p9), %s642_s6, 3  ;;  %s405_s10 = sshll.u32 (!%p155_p9), %s602_s16, 7 }
  0x12   : > { %s178_s8 = scalar_lea.vmem (!%p155_p9), [#allocation2], %s397_s7  ;;  %s648_s11 = scalar_lea.vmem (!%p155_p9), [#allocation4], %s397_s7 }
  0x13   : > { %v224_v16 = vadd.s32 (!%p155_p9), %v223_v15, %v222_v14  ;;  %s277_s9 = sshll.u32 (!%p155_p9), %s178_s8, 4  ;;  %s290_s17 = sshll.u32 (!%p155_p9), %s648_s11, 4  ;;  %s646_s9 = int_to_ptr.vmem [resolvable:$true] %s277_s9  ;;  %s658_s17 = int_to_ptr.vmem [resolvable:$true] %s290_s17 }
  0x14   : > { %s461_s26 = scalar_lea.vmem (!%p155_p9), %s646_s9, 128  ;;  %s559_s27 = smov (!%p155_p9), [#allocation2]  }
  0x15   : > { %vm226_vm3 = vcmp.lt.s32.totalorder (!%p155_p9), %v224_v16, 18  ;;  %p462_p11 = scmp.ne.s32.totalorder (!%p155_p9), %s646_s9, %s461_s26 }
  0x17   : > { %s187_s24 = scalar_select %p186_p10, %s602_s16, 2 }
  0x18   : > { %p463_p12 = pnand %p462_p11, %p619_p5 }
  0x19   : > { %s399_s25 = sshll.u32 %s187_s24, 3  ;;  %s656_s24 = scalar_lea.hbm %s731_s2, %s405_s10 }
  0x1a   : > { %s189_s28 = scalar_lea.vmem %s729_s0, %s399_s25  ;;  %s193_s4 = scalar_lea.vmem %s730_s1, %s399_s25 }
  0x1b   : > { %v194_v1 = vld [vmem:[%s189_s28] sm:$0xff]  ;;  %s259_s25 = scalar_lea.sflag [#allocation3], %s642_s6  ;;  %p464_p13 = pneg %p463_p12 }
  0x1c   : > { %v197_v2 = vsel %vm196_vm0, %v194_v1, -inf  ;;  %v195_v3 = vld [vmem:[%s193_s4] sm:$0xff]  ;;  %s465_s28 = sshll.u32 %s559_s27, 4  ;;  %s466_s28 = int_to_ptr.vmem [resolvable:$false] %s465_s28 }
  0x1d   : > { %198 = vmax.xlane.f32.xlu0 %v197_v2  ;;  %vm225_vm2 = vcmp.ne.s32.totalorder %v195_v3, 4294967295  ;;  %s467_s29 = scalar_lea.vmem %s466_s28, 256  ;;  %p468_p0 = scmp.lt.s32.totalorder %s646_s9, %s466_s28 }
  0x1e   : > { %vm227_vm4 = vmand %vm225_vm2, %vm226_vm3  ;;  %p469_p1 = scmp.lt.s32.totalorder %s467_s29, %s461_s26 }
  0x1f   : > { %v402_v19 = vsel %vm227_vm4, 1.0, %v558_v18 }
  0x20   : > { %v239_v20 = vsel %vm229_vm5, %v402_v19, 0.0  ;;  %p470_p2 = por %p469_p1, %p468_p0 }
  0x21   : > { %v240_v23 = vrot.slane %v239_v20, 4 }
  0x22   : > { %p471_p3 = pnand %p470_p2, %p464_p13 }
  0x23   : > { %v241_v26 = vadd.f32 %v240_v23, %v239_v20 }
  0x25   : > { %v242_v31 = vrot.slane %v241_v26, 2 }
  0x27   : > { %v243_v34 = vadd.f32 %v242_v31, %v241_v26 }
  0x29   : > { %v244_v37 = vrot.slane %v243_v34, 1 }
  0x2b   : > { %v245_v39 = vadd.f32 %v244_v37, %v243_v34 }
  0x33   : > { %203 = vperm.xlu0 %455, %v195_v3  }
  0xaa   : > { %v199_v4 = vpop.xlane.xlu0 %198 }
  0xab   : > { %v210_v5 = vsub.f32 %v194_v1, %v199_v4 }
  0xad   : > { %v211_v6 = vmul.f32 1.442695, %v210_v5 }
  0xaf   : > { %457 = vpow2.f32 %v211_v6 }
  0xb2   : > { %v204_v9 = vpop.permute.xlu0 %203 }
  0xb3   : > { %vm205_vm1 = vcmp.eq.s32.totalorder %v201_v8, %v204_v9 }
  0xb4   : > { %v206_v11 = vsel %vm205_vm1, %v194_v1, 0.0 }
  0xb5   : > { %v207_v13 = vsel %vm196_vm0, %v206_v11, 0.0 }
  0xb9   : > { %v458_v10 = vpop.eup %457 }
  0xba   : > { %v213_v12 = vsel %vm196_vm0, %v458_v10, 0.0 }
  0xbb   : > { %214 = vadd.xlane.f32.xlu1 %v213_v12 }
  0xbf   : > { %208 = vadd.xlane.f32.xlu1 %v207_v13 }
 0x148   : > { %v215_v17 = vpop.xlane.xlu1 %214 }
 0x149   : > { %459 = vlog2.f32 %v215_v17 }
 0x14c   : > { %v209_v24 = vpop.xlane.xlu1 %208 }
 0x153   : > { %v460_v21 = vpop.eup %459 }
 0x154   : > { %v217_v22 = vmul.f32 0.6931472, %v460_v21 }
 0x156   : > { %v218_v25 = vadd.f32 %v217_v22, %v199_v4 }
 0x158   : > { %v219_v27 = vsub.f32 %v218_v25, %v209_v24 }
 0x15a   : > { %v228_v28 = vsel %vm227_vm4, %v219_v27, 0.0 }
 0x15b   : > { %v230_v29 = vsel %vm229_vm5, %v228_v28, 0.0 }
 0x15c   : > { %v231_v30 = vrot.slane %v230_v29, 4 }
 0x15e   : > { %v232_v32 = vadd.f32 %v231_v30, %v230_v29 }
 0x160   : > { %v233_v33 = vrot.slane %v232_v32, 2 }
 0x162   : > { %v234_v35 = vadd.f32 %v233_v33, %v232_v32 }
 0x164   : > { %v235_v36 = vrot.slane %v234_v35, 1 }
 0x166   : > { %v236_v38 = vadd.f32 %v235_v36, %v234_v35 }
 0x168   : > { %248 = vperm.xlu1 %456, %v236_v38  }
 0x16c   : > { %254 = vperm.xlu1 %456, %v245_v39  }
 0x1e7   : > { %v249_v40 = vpop.permute.xlu1 %248 }
 0x1e8   : > { %251 = vst [vmem:[%s178_s8] sm:$0xff] %v249_v40 }
 0x1e9   : > { %474 = shalt.err (!%p471_p3)
}
 0x1ea   : > { %s475_s30 = scalar_lea.hbm %s656_s24, 128  ;;  %s479_s7 = scalar_lea.hbm %s731_s2, 384 }
 0x1eb   : > { %p476_p4 = scmp.ne.s32.totalorder %s656_s24, %s475_s30  ;;  %p480_p9 = scmp.lt.u32.totalorder %s656_s24, %s731_s2 }
 0x1ec   : > { %p481_p10 = scmp.lt.u32.totalorder %s479_s7, %s475_s30  ;;  %p483_p12 = scmp.lt.u32.totalorder %s475_s30, %s656_s24 }
 0x1ed   : > { %p477_p7 = pnand %p476_p4, %p619_p5 }
 0x1ee   : > { %p482_p11 = por %p481_p10, %p480_p9 }
 0x1ef   : > { %p478_p8 = pneg %p477_p7 }
 0x1f0   : > { %p484_p13 = por %p483_p12, %p482_p11 }
 0x1f2   : > { %p485_p0 = pnand %p484_p13, %p478_p8 }
 0x1f4   : > { %488 = shalt.err (!%p485_p0)
}
 0x1f5   : > { %409 = dma.vmem_to_hbm [thread:$0]  (%p619_p5), %s646_s9, 128, %s656_s24, %s259_s25   ;;  %v255_v41 = vpop.permute.xlu1 %254 }
 0x1f6   : > { %s687_s27 = scalar_lea.hbm %s732_s3, %s405_s10  ;;  %257 = vst [vmem:[%s648_s11] sm:$0xff] %v255_v41  ;;  %s264_s28 = scalar_lea.sflag [#allocation5], %s642_s6 }
 0x1f7   : > { %s489_s29 = scalar_lea.vmem %s658_s17, 128  ;;  %s560_s30 = smov [#allocation4]  }
 0x1f8   : > { %p490_p1 = scmp.ne.s32.totalorder %s658_s17, %s489_s29  ;;  %s493_s4 = sshll.u32 %s560_s30, 4  ;;  %s494_s4 = int_to_ptr.vmem [resolvable:$false] %s493_s4 }
 0x1f9   : > { %s495_s5 = scalar_lea.vmem %s494_s4, 256  ;;  %p496_p4 = scmp.lt.s32.totalorder %s658_s17, %s494_s4 }
 0x1fa   : > { %p491_p2 = pnand %p490_p1, %p619_p5  ;;  %p497_p7 = scmp.lt.s32.totalorder %s495_s5, %s489_s29 }
 0x1fc   : > { %p492_p3 = pneg %p491_p2  ;;  %p498_p8 = por %p497_p7, %p496_p4 }
 0x1fe   : > { %p499_p9 = pnand %p498_p8, %p492_p3 }
 0x200   : > { %502 = shalt.err (!%p499_p9)
}
 0x201   : > { %s503_s16 = scalar_lea.hbm %s687_s27, 128  ;;  %s507_s10 = scalar_lea.hbm %s732_s3, 384 }
 0x202   : > { %p504_p10 = scmp.ne.s32.totalorder %s687_s27, %s503_s16  ;;  %p508_p13 = scmp.lt.u32.totalorder %s687_s27, %s732_s3 }
 0x203   : > { %p509_p0 = scmp.lt.u32.totalorder %s507_s10, %s503_s16  ;;  %p511_p2 = scmp.lt.u32.totalorder %s503_s16, %s687_s27 }
 0x204   : > { %p505_p11 = pnand %p504_p10, %p619_p5 }
 0x205   : > { %p510_p1 = por %p509_p0, %p508_p13 }
 0x206   : > { %p506_p12 = pneg %p505_p11 }
 0x207   : > { %p512_p3 = por %p511_p2, %p510_p1 }
 0x209   : > { %p513_p4 = pnand %p512_p3, %p506_p12 }
 0x20b   : > { %516 = shalt.err (!%p513_p4)
}
 0x20c   : > { %410 = dma.vmem_to_hbm [thread:$0]  (%p619_p5), %s658_s17, 128, %s687_s27, %s264_s28  }
 0x20d PF: > { %p420_p7 = scmp.ge.s32.totalorder %s555_s15, 2  ;;  %s302_s25 = sand.u32 1, %s543_s12  }
 0x20e   : > { %s303_s7 = scalar_lea.sflag [#allocation3], %s302_s25 }
 0x20f   : > { %p414_p8 = pnand %p420_p7, %p623_p6 }
 0x211   : > { %534 = dma.done.wait (!%p414_p8), %s303_s7, 128  }
 0x212   : > { %536 = vsyncadd (!%p414_p8), %s303_s7, 4294967168  ;;  %s312_s8 = scalar_lea.sflag [#allocation5], %s302_s25 }
 0x213   : > { %538 = dma.done.wait (!%p414_p8), %s312_s8, 128  }
 0x214   : > { %540 = vsyncadd (!%p414_p8), %s312_s8, 4294967168  ;;  %p17_p5 = scmp.ge.s32.totalorder %s606_s18, 5   ;;  %s735_s12 = smov %s547_s13 }
 0x215   : > { %s736_s13 = smov %s551_s14  ;;  %s737_s14 = smov %s617_s21 }
 0x216   : > { %s738_s15 = smov %s606_s18  ;;  %19 = sbr.rel (!%p17_p5) target bundleno = 5 (0x5), region = 83 }
 0x21d   :  { %317 = vsyncpa [#allocation3], 1 }
 0x21e   :  { %319 = vsyncpa [#allocation3 + $0x1], 1 }
 0x21f   :  { %320 = vsyncpa [#allocation5], 1 }
 0x220   :  { %322 = vsyncpa [#allocation5 + $0x1], 1 }

</bundles_post_ra>
